<compile_context>
chip_gen: v7x
topology: tpu7x:2x2x1
jax: 0.10.0
libtpu: 0.0.40
codegen_flags: <defaults>
</compile_context>

<pallas_src>
import functools

import jax
import jax.numpy as jnp
from jax.experimental import pallas as pl
from jax.experimental.pallas import tpu as pltpu

P_IN = 30
H = 20
OUT = 1

# Upper bound on the batch tile.  After lane padding (30 -> 128, 1 -> 128) an
# x tile plus an output tile cost ~TILE_B * 512 B per buffer, double-buffered,
# so 2048 rows is ~4 MiB of VMEM -- comfortably inside v7x's 32 MiB scoped
# default while large enough to keep per-grid-step overhead (~0.35 us) at a
# few percent of per-tile compute on v5e/v6e/v7x.
TILE_B = 2048


def _round_up(n, m):
    return ((n + m - 1) // m) * m


def _choose_tiling(batch, tile_cap):
    """Pick (tile, grid) with tile a multiple of 8, tile*grid >= batch, and at
    most 8*grid - 1 padded rows (instead of up to tile - 1)."""
    batch = max(int(batch), 1)
    grid = -(-batch // tile_cap)            # cdiv
    tile = _round_up(-(-batch // grid), 8)  # balanced tile, 8-sublane aligned
    return tile, grid


def _mlp_kernel(x_ref, w1_ref, w2_ref, w3_ref, o_ref):
    """One batch tile: x(t,30) @ W1(30,20) -> relu -> @ W2(20,20) -> relu ->
    lane-reduce against the W3 row (1,20) -> sigmoid -> (t,1)."""
    x = x_ref[...]

    # Layers 1 and 2 on the MXU (f32 accumulate).  These two matmuls are the
    # binding work of the kernel; everything below runs on otherwise-idle
    # VPU / XLU / EUP slots.
    h1 = jnp.dot(x, w1_ref[...], preferred_element_type=jnp.float32)
    h1 = jnp.maximum(h1, 0.0)

    h2 = jnp.dot(h1, w2_ref[...], preferred_element_type=jnp.float32)
    h2 = jnp.maximum(h2, 0.0)

    # Layer 3 has N=1: an MXU pass would waste 127/128 result lanes and add
    # load on the binding unit, so use a VPU multiply + XLU lane reduce.
    logits = jnp.sum(h2 * w3_ref[...], axis=-1, keepdims=True)

    # sigmoid(z) = 0.5 * (tanh(z/2) + 1): single EUP op per vreg, no divide;
    # identical to XLA's own lowering of jax.nn.sigmoid.
    o_ref[...] = (0.5 * (jnp.tanh(0.5 * logits) + 1.0)).astype(o_ref.dtype)


def prepare_params(w1, w2, w3):
    """One-time weight preprocessing (hoisted out of the per-call path):
    pre-transpose W1/W2 to (in, out) so the kernel computes plain x @ W;
    W3 stays as its (1, H) row for the lane-reduce form."""
    return jnp.transpose(w1), jnp.transpose(w2), w3


@functools.partial(jax.jit, static_argnames=("tile_b",))
def neural_net_forward(x, w1_t, w2_t, w3_row, *, tile_b=TILE_B):
    """x: (B, 30) f32.  w1_t: (30, 20), w2_t: (20, 20), w3_row: (1, 20)."""
    B = x.shape[0]
    tile, grid_b = _choose_tiling(B, tile_b)
    padded_b = tile * grid_b
    if padded_b != B:
        x = jnp.pad(x, ((0, padded_b - B), (0, 0)))

    cost = pl.CostEstimate(
        flops=2 * padded_b * (P_IN * H + H * H + H),
        transcendentals=padded_b,  # one tanh per row (sigmoid)
        bytes_accessed=padded_b * (P_IN + OUT) * 4
        + (P_IN * H + H * H + H * OUT) * 4,
    )

    out = pl.pallas_call(
        _mlp_kernel,
        out_shape=jax.ShapeDtypeStruct((padded_b, OUT), jnp.float32),
        grid=(grid_b,),
        in_specs=[
            # x: streamed per batch tile -> automatic double-buffered pipeline.
            pl.BlockSpec((tile, P_IN), lambda i: (i, 0)),
            # weights: constant block index -> DMA'd once, VMEM-resident.
            pl.BlockSpec((P_IN, H), lambda i: (0, 0)),
            pl.BlockSpec((H, H), lambda i: (0, 0)),
            pl.BlockSpec((OUT, H), lambda i: (0, 0)),
        ],
        out_specs=pl.BlockSpec((tile, OUT), lambda i: (i, 0)),
        compiler_params=pltpu.CompilerParams(
            dimension_semantics=("parallel",),  # megacore sharding on v7x
        ),
        cost_estimate=cost,
    )(x, w1_t, w2_t, w3_row)

    return out[:B]
    # NOTE: feeding x/weights as bf16 (accumulating in f32 via
    # preferred_element_type) would roughly halve the binding MXU pass count
    # and the HBM traffic if the accuracy budget allows it; kept f32 here to
    # match the PyTorch reference within 1e-5.


def _reference_forward(x, w1, w2, w3):
    h1 = jnp.maximum(x @ w1.T, 0.0)
    h2 = jnp.maximum(h1 @ w2.T, 0.0)
    return jax.nn.sigmoid(h2 @ w3.T)


if __name__ == "__main__":
    key = jax.random.PRNGKey(0)
    kx, k1, k2, k3 = jax.random.split(key, 4)

    # Deterministic PyTorch-style init: U(-1/sqrt(fan_in), 1/sqrt(fan_in))
    def init_linear(k, out_f, in_f):
        bound = 1.0 / jnp.sqrt(jnp.float32(in_f))
        return jax.random.uniform(k, (out_f, in_f), jnp.float32, -bound, bound)

    w1 = init_linear(k1, H, P_IN)   # (20, 30)
    w2 = init_linear(k2, H, H)      # (20, 20)
    w3 = init_linear(k3, OUT, H)    # (1, 20)

    # One-time weight prep (outside the per-call forward path).
    w1_t, w2_t, w3_row = prepare_params(w1, w2, w3)

    # Small primary check (single tile).
    B = 8
    x = jax.random.normal(kx, (B, P_IN), dtype=jnp.float32)
    out = jax.block_until_ready(neural_net_forward(x, w1_t, w2_t, w3_row))
    ref = _reference_forward(x, w1, w2, w3)
    assert out.shape == (B, OUT), out.shape
    assert jnp.allclose(out, ref, atol=1e-5, rtol=1e-5), "mismatch vs reference"

    # Multi-tile + ragged-batch sanity check (grid > 1, padded remainder).
    B2 = 300
    x2 = jax.random.normal(kx, (B2, P_IN), dtype=jnp.float32)
    out2 = jax.block_until_ready(
        neural_net_forward(x2, w1_t, w2_t, w3_row, tile_b=128))
    ref2 = _reference_forward(x2, w1, w2, w3)
    assert out2.shape == (B2, OUT), out2.shape
    assert jnp.allclose(out2, ref2, atol=1e-5, rtol=1e-5), "mismatch (tiled)"

    print("KERNEL_OK")
</pallas_src>

<mosaic_0001>
module attributes {stable_mosaic.version = 11 : i64} {
  func.func @_mlp_kernel(%arg0: i32, %arg1: memref<8x30xf32, #tpu.memory_space<vmem>>, %arg2: memref<30x20xf32, #tpu.memory_space<vmem>>, %arg3: memref<20x20xf32, #tpu.memory_space<vmem>>, %arg4: memref<1x20xf32, #tpu.memory_space<vmem>>, %arg5: memref<8x1xf32, #tpu.memory_space<vmem>>) attributes {dimension_semantics = [#tpu.dimension_semantics<parallel>], iteration_bounds = array<i64: 1>, scalar_prefetch = 0 : i64, scratch_operands = 0 : i64, tpu.core_type = #tpu.core_type<tc>, window_params = [{transform_indices = @transform_0, window_bounds = array<i64: 8, 30>}, {pipeline_mode = #tpu.pipeline_mode<synchronous>, transform_indices = @transform_1, window_bounds = array<i64: 30, 20>}, {pipeline_mode = #tpu.pipeline_mode<synchronous>, transform_indices = @transform_2, window_bounds = array<i64: 20, 20>}, {pipeline_mode = #tpu.pipeline_mode<synchronous>, transform_indices = @transform_3, window_bounds = array<i64: 1, 20>}, {transform_indices = @transform_4, window_bounds = array<i64: 8, 1>}]} {
    %c0 = arith.constant 0 : index
    %c0_0 = arith.constant 0 : index
    %0 = vector.load %arg1[%c0, %c0_0] : memref<8x30xf32, #tpu.memory_space<vmem>>, vector<8x30xf32>
    %c0_1 = arith.constant 0 : index
    %c0_2 = arith.constant 0 : index
    %1 = vector.load %arg2[%c0_1, %c0_2] : memref<30x20xf32, #tpu.memory_space<vmem>>, vector<30x20xf32>
    %cst = arith.constant dense<0.000000e+00> : vector<8x20xf32>
    %2 = tpu.matmul %0, %1, %cst {dimension_numbers = #tpu.dot_dimension_numbers<[1], [0], [0], [1], [0, 0, 1, 1], [], []>} : vector<8x30xf32>, vector<30x20xf32>, vector<8x20xf32> -> vector<8x20xf32>
    %cst_3 = arith.constant 0.000000e+00 : f32
    %3 = vector.broadcast %cst_3 : f32 to vector<8x20xf32>
    %4 = arith.maximumf %2, %3 : vector<8x20xf32>
    %c0_4 = arith.constant 0 : index
    %c0_5 = arith.constant 0 : index
    %5 = vector.load %arg3[%c0_4, %c0_5] : memref<20x20xf32, #tpu.memory_space<vmem>>, vector<20x20xf32>
    %cst_6 = arith.constant dense<0.000000e+00> : vector<8x20xf32>
    %6 = tpu.matmul %4, %5, %cst_6 {dimension_numbers = #tpu.dot_dimension_numbers<[1], [0], [0], [1], [0, 0, 1, 1], [], []>} : vector<8x20xf32>, vector<20x20xf32>, vector<8x20xf32> -> vector<8x20xf32>
    %cst_7 = arith.constant 0.000000e+00 : f32
    %7 = vector.broadcast %cst_7 : f32 to vector<8x20xf32>
    %8 = arith.maximumf %6, %7 : vector<8x20xf32>
    %c0_8 = arith.constant 0 : index
    %c0_9 = arith.constant 0 : index
    %9 = vector.load %arg4[%c0_8, %c0_9] : memref<1x20xf32, #tpu.memory_space<vmem>>, vector<1x20xf32>
    %10 = vector.broadcast %9 : vector<1x20xf32> to vector<8x20xf32>
    %11 = arith.mulf %8, %10 : vector<8x20xf32>
    %cst_10 = arith.constant dense<0.000000e+00> : vector<8xf32>
    %12 = vector.multi_reduction <add>, %11, %cst_10 [1] : vector<8x20xf32> to vector<8xf32>
    %13 = vector.shape_cast %12 : vector<8xf32> to vector<8x1xf32>
    %cst_11 = arith.constant 5.000000e-01 : f32
    %14 = vector.broadcast %cst_11 : f32 to vector<8x1xf32>
    %15 = arith.mulf %14, %13 : vector<8x1xf32>
    %16 = math.tanh %15 : vector<8x1xf32>
    %cst_12 = arith.constant 1.000000e+00 : f32
    %17 = vector.broadcast %cst_12 : f32 to vector<8x1xf32>
    %18 = arith.addf %16, %17 : vector<8x1xf32>
    %cst_13 = arith.constant 5.000000e-01 : f32
    %19 = vector.broadcast %cst_13 : f32 to vector<8x1xf32>
    %20 = arith.mulf %19, %18 : vector<8x1xf32>
    %c0_14 = arith.constant 0 : index
    %c0_15 = arith.constant 0 : index
    %21 = vector.load %arg5[%c0_14, %c0_15] : memref<8x1xf32, #tpu.memory_space<vmem>>, vector<8x1xf32>
    tpu.vector_store %arg5[%c0_14, %c0_15], %20 {strides = array<i32>} : memref<8x1xf32, #tpu.memory_space<vmem>>, vector<8x1xf32>,
    return
  }
  func.func @transform_0(%arg0: i32) -> (i32, i32) {
    %c0_i32 = arith.constant 0 : i32
    %c0_i32_0 = arith.constant 0 : i32
    return %arg0, %c0_i32 : i32, i32
  }
  func.func @transform_1(%arg0: i32) -> (i32, i32) {
    %c0_i32 = arith.constant 0 : i32
    %c0_i32_0 = arith.constant 0 : i32
    %c0_i32_1 = arith.constant 0 : i32
    return %c0_i32, %c0_i32_0 : i32, i32
  }
  func.func @transform_2(%arg0: i32) -> (i32, i32) {
    %c0_i32 = arith.constant 0 : i32
    %c0_i32_0 = arith.constant 0 : i32
    %c0_i32_1 = arith.constant 0 : i32
    return %c0_i32, %c0_i32_0 : i32, i32
  }
  func.func @transform_3(%arg0: i32) -> (i32, i32) {
    %c0_i32 = arith.constant 0 : i32
    %c0_i32_0 = arith.constant 0 : i32
    %c0_i32_1 = arith.constant 0 : i32
    return %c0_i32, %c0_i32_0 : i32, i32
  }
  func.func @transform_4(%arg0: i32) -> (i32, i32) {
    %c0_i32 = arith.constant 0 : i32
    %c0_i32_0 = arith.constant 0 : i32
    return %arg0, %c0_i32 : i32, i32
  }
}

</mosaic_0001>

<bundles_post_ra>
// kernel: neural_net_forward.1
= control target key start
LH: loop header
LB: loop body
LE: loop exit
PB: predicated region body
PF: predicated region fallthrough
CT: control target
= control target key end

     0   :  { %v254_v0 = vmov 0.0|0.0   ;;  %vm26_vm0 = vcmask 1045504   ;;  %vm255_vm1 = vmmov 0   ;;  %v256_v6 = vmov 0.0   ;;  %s313_s1 = inlined_call_operand.vmem [shape: f32[30,20], index: 1, kind: input, shape index: {}]   ;;  %s314_s2 = inlined_call_operand.vmem [shape: f32[20,20], index: 2, kind: input, shape index: {}]   ;;  %s315_s0 = inlined_call_operand.vmem [shape: f32[8,30], index: 0, kind: input, shape index: {}]   ;;  %s316_s3 = inlined_call_operand.vmem [shape: f32[1,20], index: 3, kind: input, shape index: {}]   ;;  %s317_s4 = inlined_call_operand.vmem [shape: f32[8,1], index: 4, kind: output, shape index: {}]  }
   0x1   :  { %238 = vmatprep.subr.bf16.mxu0 %v254_v0  ;;  %v18_v1 = vld [vmem:[%s313_s1] sm:$0xff]  ;;  %v19_v2 = vld [vmem:[%s313_s1 + $0x8] sm:$0xff]  ;;  %v20_v3 = vld [vmem:[%s313_s1 + $0x10] sm:$0xff]  ;;  %245 = vmatprep.subr.bf16.mxu1 %v254_v0  ;;  %vm257_vm2 = vmmov 1   ;;  %vm22_vm4 = vcmask 244736   ;;  %vm108_vm5 = vcmask 1043456  }
   0x2   :  { %v239_v4 = vpack.c.bf16 %v19_v2, %v18_v1  ;;  %v21_v5 = vld [vmem:[%s313_s1 + $0x18] sm:$0x3f]  ;;  %226 = vmatprep.mubr.msk.f32.mxu0 %vm255_vm1, %v256_v6  ;;  %235 = vmatprep.mubr.msk.f32.mxu1 %vm255_vm1, %v256_v6  ;;  %v101_v7 = vld [vmem:[%s314_s2] sm:$0xff]  ;;  %v102_v8 = vld [vmem:[%s314_s2 + $0x8] sm:$0xff]  ;;  %vm104_vm6 = vcmask 162816   ;;  %vm198_vm7 = vcmask 7168  }
   0x3   :  { %v242_v9 = vpack.c.bf16 %v21_v5, %v20_v3  ;;  %v246_v10 = vpack.c.bf16 %v102_v8, %v101_v7  ;;  %vm243_vm3 = vmpackc.low %vm26_vm0, %vm257_vm2  ;;  %v17_v11 = vld [vmem:[%s315_s0] sm:$0xff]  ;;  %v103_v12 = vld [vmem:[%s314_s2 + $0x10] sm:$0xf] }
   0x4   :  { %240 = vmatpush3.bf16.msra.mxu0 %v239_v4  ;;  %v208_v17 = vld [vmem:[%s316_s3] ss:$0 sm:$0xff] }
   0x5   :  { %241 = vmatprep.subr.bf16.mxu0 %v254_v0  ;;  %247 = vmatpush3.bf16.msra.mxu1 %v246_v10 }
   0x6   :  { %233 = vmatprep.subr.mxu1 %v256_v6 }
   0x8   :  { %244 = vmatpush3.bf16.msk.msra.mxu0 %vm243_vm3, %v242_v9 }
   0x9   :  { %234 = vmatpush3.msk.msra.mxu1 %vm108_vm5, %v103_v12 }
   0xb   :  { %227 = vmatmul.mubr.msk.f32.vlgmr.msra.gmra.mrb[0].mxu0 %vm22_vm4, %v17_v11 }
  0xde   :  { %v96_v13 = vpop.f32.mrb[0].mxu0 }
  0xdf   :  { %v100_v14 = vmax.f32 %v96_v13, 0.0  ;;  %v228_v15 = vpop.f32.mrb[1].mxu0 }
  0xe1   :  { %236 = vmatmul.mubr.msk.f32.vlgmr.msra.gmra.mrb[0].mxu1 %vm104_vm6, %v100_v14 }
 0x1b4   :  { %v178_v16 = vpop.f32.mrb[0].mxu1 }
 0x1b5   :  { %v182_v18 = vmax.f32 %v178_v16, 0.0  ;;  %v237_v19 = vpop.f32.mrb[1].mxu1 }
 0x1b7   :  { %v190_v20 = vmul.f32 %v208_v17, %v182_v18 }
 0x1b9   :  { %v191_v21 = vsel %vm104_vm6, %v190_v20, 0.0 }
 0x1ba   :  { %192 = vadd.xlane.f32.xlu0 %v191_v21 }
 0x247   :  { %v193_v22 = vpop.xlane.xlu0 %192 }
 0x248   :  { %v194_v23 = vmul.f32 0.5, %v193_v22 }
 0x24a   :  { %252 = vtanh.f32 %v194_v23 }
 0x254   :  { %v253_v24 = vpop.eup %252 }
 0x255   :  { %v196_v25 = vadd.f32 1.0, %v253_v24 }
 0x257   :  { %v197_v26 = vmul.f32 0.5, %v196_v25 }
 0x259   :  { %199 = vst.msk [vmem:[%s317_s4] sm:$0xff] %vm198_vm7, %v197_v26 }

</bundles_post_ra>
